<compile_context>
chip_gen: v7x
topology: tpu7x:2x2x1
jax: 0.10.0
libtpu: 0.0.40
codegen_flags: <defaults>
</compile_context>

<pallas_src>
import jax
import jax.numpy as jnp
from jax import lax
from jax.experimental import pallas as pl
from jax.experimental.pallas import tpu as pltpu


_TILE = 512  # square output tiles: 512*512*4 B = 1 MiB f32, rank-independent;
             # multiple of (8,128) sublane/lane tiling for f32/bf16/int8.


def _diag_full_kernel(values_ref, out_ref):
    """Whole-array diag: values_ref is (1, rank), out_ref is (rank, rank)."""
    rank = out_ref.shape[0]
    rows = lax.broadcasted_iota(jnp.int32, (rank, rank), 0)
    cols = lax.broadcasted_iota(jnp.int32, (rank, rank), 1)
    # values_ref[...] is (1, rank): broadcasts down sublanes; scalar zero elsewhere.
    out_ref[...] = jnp.where(rows == cols, values_ref[...],
                             jnp.zeros((), out_ref.dtype))


def _diag_tiled_kernel(values_ref, out_ref):
    """2-D tiled diag: values_ref is (1, tn), out_ref is (tm, tn), tm == tn."""
    i = pl.program_id(0)
    j = pl.program_id(1)
    tm, tn = out_ref.shape

    @pl.when(i == j)
    def _():
        # Square tiles with equal row/col offsets: global diagonal == local diagonal.
        rows = lax.broadcasted_iota(jnp.int32, (tm, tn), 0)
        cols = lax.broadcasted_iota(jnp.int32, (tm, tn), 1)
        out_ref[...] = jnp.where(rows == cols, values_ref[...],
                                 jnp.zeros((), out_ref.dtype))

    @pl.when(i != j)
    def _():
        # Off-diagonal tiles: pure zero writeback, no VPU work.
        out_ref[...] = jnp.zeros_like(out_ref)


def task_specific_singular_value_forward(values: jax.Array) -> jax.Array:
    """Pallas equivalent of TaskSpecificSingularValue.forward(): diag(values)."""
    (rank,) = values.shape
    values_2d = values.reshape(1, rank)  # lane-major layout for the broadcast
    itemsize = jnp.dtype(values.dtype).itemsize

    if rank <= _TILE:
        # Small rank: single whole-array VMEM block, no grid loop.
        return pl.pallas_call(
            _diag_full_kernel,
            out_shape=jax.ShapeDtypeStruct((rank, rank), values.dtype),
            in_specs=[pl.BlockSpec(memory_space=pltpu.MemorySpace.VMEM)],
            out_specs=pl.BlockSpec(memory_space=pltpu.MemorySpace.VMEM),
        )(values_2d)

    # Large rank: 2-D cdiv grid of square tiles.  Edge blocks are masked by
    # Pallas, so non-divisible ranks never fall back to a rank^2 VMEM block.
    grid = (pl.cdiv(rank, _TILE), pl.cdiv(rank, _TILE))
    return pl.pallas_call(
        _diag_tiled_kernel,
        out_shape=jax.ShapeDtypeStruct((rank, rank), values.dtype),
        grid=grid,
        in_specs=[pl.BlockSpec((1, _TILE), lambda i, j: (0, j))],
        out_specs=pl.BlockSpec((_TILE, _TILE), lambda i, j: (i, j)),
        compiler_params=pltpu.CompilerParams(
            dimension_semantics=("parallel", "parallel")),
        cost_estimate=pl.CostEstimate(
            flops=0,
            transcendentals=0,
            bytes_accessed=rank * rank * itemsize + rank * itemsize),
    )(values_2d)


class TaskSpecificSingularValue:
    """JAX mirror of the PyTorch module: values = ones(rank); forward() = diag(values)."""

    def __init__(self, rank: int, dtype=jnp.float32):
        self.rank = rank          # int, matching the PyTorch reference
        self.dtype = dtype
        self.values = jnp.ones((rank,), dtype=dtype)  # torch.ones(rank, dtype=dtype)

    def __call__(self) -> jax.Array:
        return task_specific_singular_value_forward(self.values)


if __name__ == "__main__":
    key = jax.random.PRNGKey(0)

    # Small-rank path (the common LoRA case).
    rank = 32
    module = TaskSpecificSingularValue(rank=rank, dtype=jnp.float32)
    # Perturb the ones-init deterministically so the diag placement is actually tested.
    module.values = module.values + 0.01 * jax.random.normal(key, (rank,), dtype=jnp.float32)
    out = jax.block_until_ready(module())
    ref = jnp.diag(module.values)
    assert out.shape == (rank, rank)
    assert out.dtype == jnp.float32
    assert bool(jnp.array_equal(out, ref))

    # Tiled 2-D path with a non-divisible rank (exercises cdiv edge masking
    # and the off-diagonal zero fast path).
    big_rank = 640
    big = TaskSpecificSingularValue(rank=big_rank, dtype=jnp.float32)
    big.values = big.values + 0.01 * jax.random.normal(
        jax.random.PRNGKey(1), (big_rank,), dtype=jnp.float32)
    big_out = jax.block_until_ready(big())
    assert big_out.shape == (big_rank, big_rank)
    assert bool(jnp.array_equal(big_out, jnp.diag(big.values)))

    print("KERNEL_OK")
</pallas_src>

<mosaic_0001>
module attributes {stable_mosaic.version = 11 : i64} {
  func.func @_diag_full_kernel(%arg0: memref<1x32xf32, #tpu.memory_space<vmem>>, %arg1: memref<32x32xf32, #tpu.memory_space<vmem>>) attributes {dimension_semantics = [], scalar_prefetch = 0 : i64, scratch_operands = 0 : i64, tpu.core_type = #tpu.core_type<tc>} {
    %0 = tpu.iota {dimensions = array<i32: 0>} : vector<32x32xi32>
    %1 = tpu.iota {dimensions = array<i32: 1>} : vector<32x32xi32>
    %2 = arith.cmpi eq, %0, %1 : vector<32x32xi32>
    %c0 = arith.constant 0 : index
    %c0_0 = arith.constant 0 : index
    %3 = vector.load %arg0[%c0, %c0_0] : memref<1x32xf32, #tpu.memory_space<vmem>>, vector<1x32xf32>
    %cst = arith.constant 0.000000e+00 : f32
    %4 = vector.shape_cast %3 : vector<1x32xf32> to vector<1x32xf32>
    %5 = vector.broadcast %4 : vector<1x32xf32> to vector<32x32xf32>
    %6 = vector.broadcast %cst : f32 to vector<32x32xf32>
    %7 = arith.select %2, %5, %6 : vector<32x32xi1>, vector<32x32xf32>
    %c0_1 = arith.constant 0 : index
    %c0_2 = arith.constant 0 : index
    %8 = vector.load %arg1[%c0_1, %c0_2] : memref<32x32xf32, #tpu.memory_space<vmem>>, vector<32x32xf32>
    tpu.vector_store %arg1[%c0_1, %c0_2], %7 {strides = array<i32>} : memref<32x32xf32, #tpu.memory_space<vmem>>, vector<32x32xf32>,
    return
  }
}

</mosaic_0001>

<bundles_post_ra>
// kernel: tpu_custom_call.1
= control target key start
LH: loop header
LB: loop body
LE: loop exit
PB: predicated region body
PF: predicated region fallthrough
CT: control target
= control target key end

     0   :  { %6 = vsyncpa [#allocation3], 0  ;;  %s156_s0 = inlined_call_operand.hbm [shape: f32[1,32], index: 0, kind: input, shape index: {}]   ;;  %s157_s1 = inlined_call_operand.hbm [shape: f32[32,32], index: 1, kind: output, shape index: {}]  }
   0x1   :  { %7 = vsyncpa [#allocation4], 0  ;;  %s118_s6 = smov [#allocation2]   ;;  %s70_s10 = scalar_lea.hbm %s156_s0, 16 }
   0x2   :  { %s14_s7 = sshll.u32 %s118_s6, 4  ;;  %p71_p0 = scmp.ne.s32.totalorder %s156_s0, %s70_s10  ;;  %s15_s7 = int_to_ptr.vmem [resolvable:$true] %s14_s7 }
   0x3   :  { %p74_p1 = scmp.lt.u32.totalorder %s70_s10, %s156_s0 }
   0x5   :  { %p76_p2 = pnand %p74_p1, %p71_p0 }
   0x7   :  { %79 = shalt.err (!%p76_p2)
}
   0x8   :  { %s80_s15 = scalar_lea.vmem %s15_s7, 16  ;;  %s84_s16 = scalar_lea.vmem %s15_s7, 32 }
   0x9   :  { %p81_p3 = scmp.ne.s32.totalorder %s15_s7, %s80_s15  ;;  %p85_p4 = scmp.lt.s32.totalorder %s15_s7, %s15_s7 }
   0xa   :  { %p86_p5 = scmp.lt.s32.totalorder %s84_s16, %s80_s15 }
   0xc   :  { %p87_p6 = por %p86_p5, %p85_p4 }
   0xe   :  { %p88_p7 = pnand %p87_p6, %p81_p3 }
  0x10   :  { %91 = shalt.err (!%p88_p7)
}
  0x11   :  { %17 = dma.hbm_to_vmem [thread:$0]  %s156_s0, 16, %s15_s7, [#allocation3]  }
  0x12   :  { %114 = dma.done.wait [#allocation3], 16  }
  0x13   :  { %115 = vsyncadd [#allocation3], 4294967280  ;;  %v21_v0 = vlaneseq  ;;  %s119_s19 = smov [#allocation5]   ;;  %vm43_vm1 = vcmask 261120   ;;  %v65_v6 = vld [vmem:[#allocation2] ss:$0 sm:$0xff] }
  0x14   :  { %s53_s20 = sshll.u32 %s119_s19, 4  ;;  %s54_s20 = int_to_ptr.vmem [resolvable:$true] %s53_s20 }
  0x15   :  { %v22_v1 = vshrl.u32 %v21_v0, 7  ;;  %v27_v2 = vand.u32 127, %v21_v0  ;;  %s92_s0 = scalar_lea.vmem %s54_s20, 512  ;;  %p97_p9 = scmp.lt.s32.totalorder %s54_s20, %s54_s20 }
  0x16   :  { %p93_p8 = scmp.ne.s32.totalorder %s54_s20, %s92_s0  ;;  %p98_p10 = scmp.lt.s32.totalorder %s92_s0, %s92_s0 }
  0x17   :  { %v23_v3 = vadd.s32 8, %v22_v1  ;;  %v24_v4 = vadd.s32 16, %v22_v1  ;;  %v25_v5 = vadd.s32 24, %v22_v1  ;;  %vm28_vm0 = vcmp.eq.s32.totalorder %v22_v1, %v27_v2 }
  0x18   :  { %v39_v7 = vsel %vm28_vm0, %v65_v6, 0.0  ;;  %p99_p11 = por %p98_p10, %p97_p9 }
  0x19   :  { %vm29_vm2 = vcmp.eq.s32.totalorder %v23_v3, %v27_v2  ;;  %vm30_vm3 = vcmp.eq.s32.totalorder %v24_v4, %v27_v2  ;;  %vm31_vm4 = vcmp.eq.s32.totalorder %v25_v5, %v27_v2  ;;  %44 = vst.msk [vmem:[#allocation5] sm:$0xff] %vm43_vm1, %v39_v7 }
  0x1a   :  { %v40_v8 = vsel %vm29_vm2, %v65_v6, 0.0  ;;  %v41_v9 = vsel %vm30_vm3, %v65_v6, 0.0  ;;  %v42_v10 = vsel %vm31_vm4, %v65_v6, 0.0  ;;  %p100_p12 = pnand %p99_p11, %p93_p8 }
  0x1b   :  { %45 = vst.msk [vmem:[#allocation5 + $0x8] sm:$0xff] %vm43_vm1, %v40_v8  ;;  %46 = vst.msk [vmem:[#allocation5 + $0x10] sm:$0xff] %vm43_vm1, %v41_v9 }
  0x1c   :  { %47 = vst.msk [vmem:[#allocation5 + $0x18] sm:$0xff] %vm43_vm1, %v42_v10 }
  0x1d   :  { %103 = shalt.err (!%p100_p12)
}
  0x1e   :  { %s104_s23 = scalar_lea.hbm %s157_s1, 512 }
  0x1f   :  { %p105_p13 = scmp.ne.s32.totalorder %s157_s1, %s104_s23  ;;  %p108_p0 = scmp.lt.u32.totalorder %s104_s23, %s157_s1 }
  0x21   :  { %p110_p1 = pnand %p108_p0, %p105_p13 }
  0x23   :  { %113 = shalt.err (!%p110_p1)
}
  0x24   :  { %s120_s28 = smov 128   ;;  %s121_s29 = smov 8  }
  0x25   :  { %59 = dma.vmem_to_hbm [thread:$0]  %s54_s20, 512, %s157_s1, [#allocation4], %s120_s28, %s120_s28, %s121_s29  }
  0x26   :  { %116 = dma.done.wait [#allocation4], 512  }
  0x27   :  { %117 = vsyncadd [#allocation4], 4294966784 }
  0x28   :  { %63 = vsyncpa [#allocation3], 1 }
  0x29   :  { %64 = vsyncpa [#allocation4], 1 }

</bundles_post_ra>
